<compile_context>
chip_gen: v5e
topology: v5e:2x2
jax: 0.10.0
libtpu: 0.0.40
codegen_flags: <defaults>
</compile_context>

<pallas_src>
import functools

import numpy as np
import jax
import jax.numpy as jnp
from jax import lax
from jax.experimental import pallas as pl
from jax.experimental.pallas import tpu as pltpu

EPS = 1e-5
_LANE = 128   # lane width (minor dim)
_SUB = 8      # sublane width (second-minor dim)


def _round_up(v, m):
    return ((v + m - 1) // m) * m


# ---------------- fused single pass: channel panel resident in VMEM ---------- #
def _fused_kernel_masked(x_ref, m_ref, g_ref, b_ref, o_ref):
    x = x_ref[...].astype(jnp.float32)                     # (N, TC)
    mbool = m_ref[...] > 0.5                               # (N, 1)
    mf = mbool.astype(jnp.float32)
    # guard empty selection (PyTorch BatchNorm1d would emit NaN); documented deviation.
    cnt = jnp.maximum(jnp.sum(mf, axis=0, keepdims=True), 1.0)      # (1, 1)
    inv_cnt = 1.0 / cnt
    xm = jnp.where(mbool, x, 0.0)
    mean = jnp.sum(xm, axis=0, keepdims=True) * inv_cnt             # (1, TC)
    d = jnp.where(mbool, x - mean, 0.0)
    var = jnp.sum(d * d, axis=0, keepdims=True) * inv_cnt           # centered (accurate)
    scale = lax.rsqrt(var + EPS) * g_ref[...]                       # EUP rsqrt
    shift = b_ref[...] - mean * scale
    y = x * scale + shift
    o_ref[...] = jnp.where(mbool, y, x).astype(o_ref.dtype)


def _fused_kernel_unmasked(x_ref, g_ref, b_ref, o_ref, *, count):
    x = x_ref[...].astype(jnp.float32)                     # (N, TC)
    inv_cnt = 1.0 / count                                  # static python float
    mean = jnp.sum(x, axis=0, keepdims=True) * inv_cnt
    d = x - mean
    var = jnp.sum(d * d, axis=0, keepdims=True) * inv_cnt
    scale = lax.rsqrt(var + EPS) * g_ref[...]
    shift = b_ref[...] - mean * scale
    o_ref[...] = (x * scale + shift).astype(o_ref.dtype)


# ------------------------ two-pass fallback: pass 1 -------------------------- #
def _stats_kernel_masked(x_ref, m_ref, g_ref, b_ref, scale_ref, shift_ref,
                         sum_sc, sumsq_sc, cnt_sc, *, n_total, tile_n):
    n = pl.program_id(1)

    @pl.when(n == 0)
    def _():
        sum_sc[...] = jnp.zeros_like(sum_sc)
        sumsq_sc[...] = jnp.zeros_like(sumsq_sc)
        cnt_sc[...] = jnp.zeros_like(cnt_sc)

    x = x_ref[...].astype(jnp.float32)                      # (TN, TC)
    rows = lax.broadcasted_iota(jnp.int32, (tile_n, 1), 0) + n * tile_n
    mbool = jnp.logical_and(rows < n_total, m_ref[...] > 0.5)
    xm = jnp.where(mbool, x, 0.0)                           # zero invalid / unmasked rows
    sum_sc[...] += jnp.sum(xm, axis=0, keepdims=True)
    sumsq_sc[...] += jnp.sum(xm * xm, axis=0, keepdims=True)
    cnt_sc[...] += jnp.sum(mbool.astype(jnp.float32), axis=0, keepdims=True)

    @pl.when(n == pl.num_programs(1) - 1)
    def _():
        cnt = jnp.maximum(cnt_sc[...], 1.0)                 # guard empty selection
        mean = sum_sc[...] / cnt
        var = sumsq_sc[...] / cnt - mean * mean
        # TODO(synk): E[x^2]-mean^2 can lose precision when |mean| >> std; the fused
        # path already uses centered variance, extend here if such inputs matter.
        scale = lax.rsqrt(var + EPS) * g_ref[...]
        scale_ref[...] = scale
        shift_ref[...] = b_ref[...] - mean * scale


def _stats_kernel_unmasked(x_ref, g_ref, b_ref, scale_ref, shift_ref,
                           sum_sc, sumsq_sc, *, n_total, tile_n, ragged):
    n = pl.program_id(1)

    @pl.when(n == 0)
    def _():
        sum_sc[...] = jnp.zeros_like(sum_sc)
        sumsq_sc[...] = jnp.zeros_like(sumsq_sc)

    x = x_ref[...].astype(jnp.float32)
    if ragged:  # static python bool: only zero out garbage tail rows when needed
        rows = lax.broadcasted_iota(jnp.int32, (tile_n, 1), 0) + n * tile_n
        x = jnp.where(rows < n_total, x, 0.0)
    sum_sc[...] += jnp.sum(x, axis=0, keepdims=True)
    sumsq_sc[...] += jnp.sum(x * x, axis=0, keepdims=True)

    @pl.when(n == pl.num_programs(1) - 1)
    def _():
        inv_cnt = 1.0 / n_total
        mean = sum_sc[...] * inv_cnt
        var = sumsq_sc[...] * inv_cnt - mean * mean
        scale = lax.rsqrt(var + EPS) * g_ref[...]
        scale_ref[...] = scale
        shift_ref[...] = b_ref[...] - mean * scale


# ------------------------ two-pass fallback: pass 2 -------------------------- #
def _apply_kernel_masked(x_ref, m_ref, scale_ref, shift_ref, o_ref):
    x = x_ref[...].astype(jnp.float32)
    y = x * scale_ref[...] + shift_ref[...]
    o_ref[...] = jnp.where(m_ref[...] > 0.5, y, x).astype(o_ref.dtype)


def _apply_kernel_unmasked(x_ref, scale_ref, shift_ref, o_ref):
    x = x_ref[...].astype(jnp.float32)
    o_ref[...] = (x * scale_ref[...] + shift_ref[...]).astype(o_ref.dtype)


# ---------------------------------- wrapper ---------------------------------- #
def _default_vmem_limit():
    cap = 64 * 1024 * 1024
    try:
        info = pltpu.get_tpu_info()
        cap = int(getattr(info, "vmem_capacity_bytes", cap))
    except Exception:
        pass
    return min(cap * 3 // 4, 100 * 1024 * 1024)


def masked_batchnorm_1d(x, gamma, beta, mask=None, *,
                        tile_n=1024, tile_c=512,
                        vmem_limit_bytes=None,
                        force_two_pass=False):
    """x: (N, C); gamma/beta: (C,); mask: (N,) bool or None."""
    N, C = x.shape
    out_dtype = x.dtype
    if vmem_limit_bytes is None:
        vmem_limit_bytes = _default_vmem_limit()

    # tiny per-channel parameter rows (the only operands we reshape/copy).
    g_row = gamma.astype(jnp.float32).reshape(1, C)
    b_row = beta.astype(jnp.float32).reshape(1, C)
    m_col = None if mask is None else mask.astype(jnp.float32).reshape(N, 1)

    # lane-dense channel blocking: block lane dim must be a multiple of 128 or
    # equal to the full C (no padding of x needed either way).
    cp128 = _round_up(C, _LANE)
    if cp128 <= max(tile_c, _LANE):
        tc = C                                   # one full-width channel panel
    else:
        tc = _round_up(min(tile_c, cp128), _LANE)
    nc = pl.cdiv(C, tc)

    in_b = jnp.dtype(x.dtype).itemsize
    out_b = jnp.dtype(out_dtype).itemsize

    # -------------------- fused single-pass path (1R + 1W of x) --------------
    def fused_footprint(tc_):
        # 2x double-buffered input + 2x output + ~4 f32 temporaries per element
        return N * tc_ * (2 * in_b + 2 * out_b + 4 * 4) + (64 << 10)

    fused_budget = int(0.8 * vmem_limit_bytes)
    tc_f = tc
    while tc_f > _LANE and fused_footprint(tc_f) > fused_budget:
        tc_f = max(_LANE, _round_up(tc_f // 2, _LANE))
    use_fused = (not force_two_pass) and fused_footprint(tc_f) <= fused_budget

    if use_fused:
        nc_f = pl.cdiv(C, tc_f)
        cparams = pltpu.CompilerParams(
            dimension_semantics=("parallel",),
            vmem_limit_bytes=vmem_limit_bytes)
        x_spec = pl.BlockSpec((N, tc_f), lambda c: (0, c))
        row_spec = pl.BlockSpec((1, tc_f), lambda c: (0, c))
        out_spec = pl.BlockSpec((N, tc_f), lambda c: (0, c))
        out_shape = jax.ShapeDtypeStruct((N, C), out_dtype)
        if mask is not None:
            return pl.pallas_call(
                _fused_kernel_masked,
                out_shape=out_shape,
                grid=(nc_f,),
                in_specs=[x_spec,
                          pl.BlockSpec((N, 1), lambda c: (0, 0)),
                          row_spec, row_spec],
                out_specs=out_spec,
                compiler_params=cparams,
            )(x, m_col, g_row, b_row)
        return pl.pallas_call(
            functools.partial(_fused_kernel_unmasked, count=float(N)),
            out_shape=out_shape,
            grid=(nc_f,),
            in_specs=[x_spec, row_spec, row_spec],
            out_specs=out_spec,
            compiler_params=cparams,
        )(x, g_row, b_row)

    # ---------------------- two-pass fallback (large N) ----------------------
    tn = min(_round_up(tile_n, _SUB), _round_up(N, _SUB))
    nn = pl.cdiv(N, tn)
    ragged_rows = (N % tn) != 0

    cparams_stats = pltpu.CompilerParams(
        dimension_semantics=("parallel", "arbitrary"),
        vmem_limit_bytes=vmem_limit_bytes)
    cparams_apply = pltpu.CompilerParams(
        dimension_semantics=("parallel", "parallel"),
        vmem_limit_bytes=vmem_limit_bytes)

    # pass 1: grid = (channel panels, row blocks); reduction axis last.
    x_spec_p1 = pl.BlockSpec((tn, tc), lambda c, n: (n, c))
    row_spec_p1 = pl.BlockSpec((1, tc), lambda c, n: (0, c))
    stats_out = (jax.ShapeDtypeStruct((1, C), jnp.float32),   # scale
                 jax.ShapeDtypeStruct((1, C), jnp.float32))   # shift
    stats_out_specs = [pl.BlockSpec((1, tc), lambda c, n: (0, c)),
                       pl.BlockSpec((1, tc), lambda c, n: (0, c))]

    if mask is not None:
        scale, shift = pl.pallas_call(
            functools.partial(_stats_kernel_masked, n_total=N, tile_n=tn),
            out_shape=stats_out,
            grid=(nc, nn),
            in_specs=[x_spec_p1,
                      pl.BlockSpec((tn, 1), lambda c, n: (n, 0)),
                      row_spec_p1, row_spec_p1],
            out_specs=stats_out_specs,
            scratch_shapes=[pltpu.VMEM((1, tc), jnp.float32),
                            pltpu.VMEM((1, tc), jnp.float32),
                            pltpu.VMEM((1, 1), jnp.float32)],
            compiler_params=cparams_stats,
        )(x, m_col, g_row, b_row)
    else:
        scale, shift = pl.pallas_call(
            functools.partial(_stats_kernel_unmasked, n_total=N, tile_n=tn,
                              ragged=ragged_rows),
            out_shape=stats_out,
            grid=(nc, nn),
            in_specs=[x_spec_p1, row_spec_p1, row_spec_p1],
            out_specs=stats_out_specs,
            scratch_shapes=[pltpu.VMEM((1, tc), jnp.float32),
                            pltpu.VMEM((1, tc), jnp.float32)],
            compiler_params=cparams_stats,
        )(x, g_row, b_row)

    # pass 2: streaming apply with larger row tiles (amortizes per-step cost,
    # matters most at v7x's 3.2 TB/s HBM).
    tn2 = min(_round_up(2 * tile_n, _SUB), _round_up(N, _SUB))
    while tn2 > _SUB and tn2 * tc * (2 * in_b + 2 * out_b) > int(0.7 * vmem_limit_bytes):
        tn2 = max(_SUB, _round_up(tn2 // 2, _SUB))
    nn2 = pl.cdiv(N, tn2)

    x_spec_p2 = pl.BlockSpec((tn2, tc), lambda n, c: (n, c))
    row_spec_p2 = pl.BlockSpec((1, tc), lambda n, c: (0, c))
    out_spec = pl.BlockSpec((tn2, tc), lambda n, c: (n, c))
    out_shape = jax.ShapeDtypeStruct((N, C), out_dtype)

    if mask is not None:
        return pl.pallas_call(
            _apply_kernel_masked,
            out_shape=out_shape,
            grid=(nn2, nc),
            in_specs=[x_spec_p2,
                      pl.BlockSpec((tn2, 1), lambda n, c: (n, 0)),
                      row_spec_p2, row_spec_p2],
            out_specs=out_spec,
            compiler_params=cparams_apply,
        )(x, m_col, scale, shift)
    return pl.pallas_call(
        _apply_kernel_unmasked,
        out_shape=out_shape,
        grid=(nn2, nc),
        in_specs=[x_spec_p2, row_spec_p2, row_spec_p2],
        out_specs=out_spec,
        compiler_params=cparams_apply,
    )(x, scale, shift)


# ---------------------------- numpy reference -------------------------------- #
def _reference(x, gamma, beta, mask):
    x_np = np.asarray(x, dtype=np.float64)
    g_np = np.asarray(gamma, dtype=np.float64)
    b_np = np.asarray(beta, dtype=np.float64)
    sel = x_np if mask is None else x_np[np.asarray(mask)]
    mu = sel.mean(axis=0)
    var = sel.var(axis=0)                        # biased, like BN training
    y = (sel - mu) / np.sqrt(var + EPS) * g_np + b_np
    if mask is None:
        out = y
    else:
        out = x_np.copy()
        out[np.asarray(mask)] = y
    return jnp.asarray(out, dtype=x.dtype)


if __name__ == "__main__":
    key = jax.random.PRNGKey(0)
    k_x, k_m, k_x2, k_x3, k_m3 = jax.random.split(key, 5)

    def check(out, ref):
        assert jnp.allclose(out, ref, atol=1e-4, rtol=1e-4), \
            float(jnp.max(jnp.abs(out - ref)))

    # --- small fused-path tests (16 tokens, 32 channels) ---
    N, C = 16, 32
    x = jax.random.normal(k_x, (N, C), dtype=jnp.float32)
    mask = jax.random.bernoulli(k_m, p=0.6, shape=(N,))
    gamma = 1.0 + 0.01 * jnp.arange(C, dtype=jnp.float32)
    beta = 0.001 * jnp.arange(C, dtype=jnp.float32)

    out = jax.block_until_ready(masked_batchnorm_1d(x, gamma, beta, mask))
    check(out, _reference(x, gamma, beta, mask))

    out = jax.block_until_ready(masked_batchnorm_1d(x, gamma, beta, None))
    check(out, _reference(x, gamma, beta, None))

    # ragged N (13 rows), fused unmasked
    x2 = jax.random.normal(k_x2, (13, C), dtype=jnp.float32)
    out = jax.block_until_ready(masked_batchnorm_1d(x2, gamma, beta, None))
    check(out, _reference(x2, gamma, beta, None))

    # ragged N, two-pass fallback, unmasked (exercises iota row masking)
    out = jax.block_until_ready(
        masked_batchnorm_1d(x2, gamma, beta, None, tile_n=8, force_two_pass=True))
    check(out, _reference(x2, gamma, beta, None))

    # C not a multiple of 128, multiple channel panels, masked: fused + two-pass
    N3, C3 = 24, 160
    x3 = jax.random.normal(k_x3, (N3, C3), dtype=jnp.float32)
    mask3 = jax.random.bernoulli(k_m3, p=0.5, shape=(N3,))
    gamma3 = 1.0 + 0.01 * jnp.arange(C3, dtype=jnp.float32)
    beta3 = 0.001 * jnp.arange(C3, dtype=jnp.float32)

    out = jax.block_until_ready(
        masked_batchnorm_1d(x3, gamma3, beta3, mask3, tile_c=128))
    check(out, _reference(x3, gamma3, beta3, mask3))

    out = jax.block_until_ready(
        masked_batchnorm_1d(x3, gamma3, beta3, mask3, tile_n=8, tile_c=128,
                            force_two_pass=True))
    check(out, _reference(x3, gamma3, beta3, mask3))

    print("KERNEL_OK")
</pallas_src>

<mosaic_0001>
module attributes {stable_mosaic.version = 11 : i64} {
  func.func @_fused_kernel_masked(%arg0: i32, %arg1: memref<16x32xf32, #tpu.memory_space<vmem>>, %arg2: memref<16x1xf32, #tpu.memory_space<vmem>>, %arg3: memref<1x32xf32, #tpu.memory_space<vmem>>, %arg4: memref<1x32xf32, #tpu.memory_space<vmem>>, %arg5: memref<16x32xf32, #tpu.memory_space<vmem>>) attributes {dimension_semantics = [#tpu.dimension_semantics<parallel>], iteration_bounds = array<i64: 1>, scalar_prefetch = 0 : i64, scratch_operands = 0 : i64, tpu.core_type = #tpu.core_type<tc>, window_params = [{transform_indices = @transform_0, window_bounds = array<i64: 16, 32>}, {pipeline_mode = #tpu.pipeline_mode<synchronous>, transform_indices = @transform_1, window_bounds = array<i64: 16, 1>}, {transform_indices = @transform_2, window_bounds = array<i64: 1, 32>}, {transform_indices = @transform_3, window_bounds = array<i64: 1, 32>}, {transform_indices = @transform_4, window_bounds = array<i64: 16, 32>}]} {
    %c0 = arith.constant 0 : index
    %c0_0 = arith.constant 0 : index
    %0 = vector.load %arg1[%c0, %c0_0] : memref<16x32xf32, #tpu.memory_space<vmem>>, vector<16x32xf32>
    %c0_1 = arith.constant 0 : index
    %c0_2 = arith.constant 0 : index
    %1 = vector.load %arg2[%c0_1, %c0_2] : memref<16x1xf32, #tpu.memory_space<vmem>>, vector<16x1xf32>
    %cst = arith.constant 5.000000e-01 : f32
    %2 = vector.broadcast %cst : f32 to vector<16x1xf32>
    %3 = arith.cmpf ogt, %1, %2 : vector<16x1xf32>
    %4 = arith.extui %3 : vector<16x1xi1> to vector<16x1xi32>
    %5 = arith.sitofp %4 : vector<16x1xi32> to vector<16x1xf32>
    %cst_3 = arith.constant dense<0.000000e+00> : vector<1xf32>
    %6 = vector.multi_reduction <add>, %5, %cst_3 [0] : vector<16x1xf32> to vector<1xf32>
    %7 = vector.shape_cast %6 : vector<1xf32> to vector<1x1xf32>
    %cst_4 = arith.constant 1.000000e+00 : f32
    %8 = vector.broadcast %cst_4 : f32 to vector<1x1xf32>
    %9 = arith.maximumf %7, %8 : vector<1x1xf32>
    %cst_5 = arith.constant 1.000000e+00 : f32
    %10 = vector.broadcast %cst_5 : f32 to vector<1x1xf32>
    %11 = arith.divf %10, %9 : vector<1x1xf32>
    %cst_6 = arith.constant 0.000000e+00 : f32
    %12 = vector.shape_cast %3 : vector<16x1xi1> to vector<16x1xi1>
    %13 = vector.broadcast %12 : vector<16x1xi1> to vector<16x32xi1>
    %14 = vector.broadcast %cst_6 : f32 to vector<16x32xf32>
    %15 = arith.select %13, %0, %14 : vector<16x32xi1>, vector<16x32xf32>
    %cst_7 = arith.constant dense<0.000000e+00> : vector<32xf32>
    %16 = vector.multi_reduction <add>, %15, %cst_7 [0] : vector<16x32xf32> to vector<32xf32>
    %17 = vector.shape_cast %16 : vector<32xf32> to vector<1x32xf32>
    %18 = vector.broadcast %11 : vector<1x1xf32> to vector<1x32xf32>
    %19 = arith.mulf %17, %18 : vector<1x32xf32>
    %20 = vector.broadcast %19 : vector<1x32xf32> to vector<16x32xf32>
    %21 = arith.subf %0, %20 : vector<16x32xf32>
    %cst_8 = arith.constant 0.000000e+00 : f32
    %22 = vector.shape_cast %3 : vector<16x1xi1> to vector<16x1xi1>
    %23 = vector.broadcast %22 : vector<16x1xi1> to vector<16x32xi1>
    %24 = vector.broadcast %cst_8 : f32 to vector<16x32xf32>
    %25 = arith.select %23, %21, %24 : vector<16x32xi1>, vector<16x32xf32>
    %26 = arith.mulf %25, %25 : vector<16x32xf32>
    %cst_9 = arith.constant dense<0.000000e+00> : vector<32xf32>
    %27 = vector.multi_reduction <add>, %26, %cst_9 [0] : vector<16x32xf32> to vector<32xf32>
    %28 = vector.shape_cast %27 : vector<32xf32> to vector<1x32xf32>
    %29 = vector.broadcast %11 : vector<1x1xf32> to vector<1x32xf32>
    %30 = arith.mulf %28, %29 : vector<1x32xf32>
    %cst_10 = arith.constant 9.99999974E-6 : f32
    %31 = vector.broadcast %cst_10 : f32 to vector<1x32xf32>
    %32 = arith.addf %30, %31 : vector<1x32xf32>
    %33 = math.rsqrt %32 : vector<1x32xf32>
    %c0_11 = arith.constant 0 : index
    %c0_12 = arith.constant 0 : index
    %34 = vector.load %arg3[%c0_11, %c0_12] : memref<1x32xf32, #tpu.memory_space<vmem>>, vector<1x32xf32>
    %35 = arith.mulf %33, %34 : vector<1x32xf32>
    %c0_13 = arith.constant 0 : index
    %c0_14 = arith.constant 0 : index
    %36 = vector.load %arg4[%c0_13, %c0_14] : memref<1x32xf32, #tpu.memory_space<vmem>>, vector<1x32xf32>
    %37 = arith.mulf %19, %35 : vector<1x32xf32>
    %38 = arith.subf %36, %37 : vector<1x32xf32>
    %39 = vector.broadcast %35 : vector<1x32xf32> to vector<16x32xf32>
    %40 = arith.mulf %0, %39 : vector<16x32xf32>
    %41 = vector.broadcast %38 : vector<1x32xf32> to vector<16x32xf32>
    %42 = arith.addf %40, %41 : vector<16x32xf32>
    %43 = vector.shape_cast %3 : vector<16x1xi1> to vector<16x1xi1>
    %44 = vector.broadcast %43 : vector<16x1xi1> to vector<16x32xi1>
    %45 = arith.select %44, %42, %0 : vector<16x32xi1>, vector<16x32xf32>
    %c0_15 = arith.constant 0 : index
    %c0_16 = arith.constant 0 : index
    %46 = vector.load %arg5[%c0_15, %c0_16] : memref<16x32xf32, #tpu.memory_space<vmem>>, vector<16x32xf32>
    tpu.vector_store %arg5[%c0_15, %c0_16], %45 {strides = array<i32>} : memref<16x32xf32, #tpu.memory_space<vmem>>, vector<16x32xf32>,
    return
  }
  func.func @transform_0(%arg0: i32) -> (i32, i32) {
    %c0_i32 = arith.constant 0 : i32
    %c0_i32_0 = arith.constant 0 : i32
    return %c0_i32, %arg0 : i32, i32
  }
  func.func @transform_1(%arg0: i32) -> (i32, i32) {
    %c0_i32 = arith.constant 0 : i32
    %c0_i32_0 = arith.constant 0 : i32
    %c0_i32_1 = arith.constant 0 : i32
    return %c0_i32, %c0_i32_0 : i32, i32
  }
  func.func @transform_2(%arg0: i32) -> (i32, i32) {
    %c0_i32 = arith.constant 0 : i32
    %c0_i32_0 = arith.constant 0 : i32
    return %c0_i32, %arg0 : i32, i32
  }
  func.func @transform_3(%arg0: i32) -> (i32, i32) {
    %c0_i32 = arith.constant 0 : i32
    %c0_i32_0 = arith.constant 0 : i32
    return %c0_i32, %arg0 : i32, i32
  }
  func.func @transform_4(%arg0: i32) -> (i32, i32) {
    %c0_i32 = arith.constant 0 : i32
    %c0_i32_0 = arith.constant 0 : i32
    return %c0_i32, %arg0 : i32, i32
  }
}

</mosaic_0001>

<bundles_post_ra>
// kernel: tpu_custom_call.1
= control target key start
LH: loop header
LB: loop body
LE: loop exit
PB: predicated region body
PF: predicated region fallthrough
CT: control target
= control target key end

     0   :  { %vm28_vm0 = vcmask 7168   ;;  %v181_v2 = vmov 0   ;;  %s256_s0 = inlined_call_operand.vmem [shape: f32[16,32], index: 0, kind: input, shape index: {}]   ;;  %s257_s1 = inlined_call_operand.vmem [shape: f32[16,1], index: 1, kind: input, shape index: {}]   ;;  %s258_s2 = inlined_call_operand.vmem [shape: f32[1,32], index: 2, kind: input, shape index: {}]   ;;  %s259_s3 = inlined_call_operand.vmem [shape: f32[1,32], index: 3, kind: input, shape index: {}]   ;;  %s260_s4 = inlined_call_operand.hbm [shape: f32[16,32], index: 4, kind: output, shape index: {}]  }
   0x1   :  { %v20_v0 = vld [vmem:[%s257_s1] sm:$0xff]  ;;  %v21_v1 = vld [vmem:[%s257_s1 + $0x8] sm:$0xff]  ;;  %149 = vset.pattern.permute.xlu0 %v181_v2  ;;  %150 = vset.pattern.permute.xlu1 %v181_v2 }
   0x2   :  { %vm22_vm1 = vcmp.gt.f32.partialorder %v20_v0, 0.5  ;;  %vm23_vm2 = vcmp.gt.f32.partialorder %v21_v1, 0.5 }
   0x3   :  { %9 = vsyncpa [#allocation3], 0  ;;  %v24_v3 = vsel %vm22_vm1, 1, %v181_v2  ;;  %v182_v4 = vmov 0.0   ;;  %v25_v11 = vsel %vm23_vm2, 1, %v181_v2  ;;  %v222_v29 = vld [vmem:[%s256_s0] sm:$0xff] }
   0x4   :  { %v142_v5 = vsel %vm22_vm1, 1.0, %v182_v4  ;;  %v143_v6 = vsel %vm23_vm2, 1.0, %v182_v4  ;;  %55 = vperm.xlu0 %149, %v24_v3   ;;  %vm64_vm8 = vcmask 261120   ;;  %v19_v31 = vld [vmem:[%s256_s0 + $0x8] sm:$0xff]  ;;  %v107_v3 = vld [vmem:[%s258_s2] sm:$0x1] }
   0x5   :  { %v29_v7 = vsel %vm28_vm0, %v142_v5, 0.0  ;;  %v30_v8 = vsel %vm28_vm0, %v143_v6, 0.0  ;;  %s183_s25 = smov [#allocation2]   ;;  %s130_s28 = sshll.u32 %s260_s4, 4  ;;  %s131_s28 = int_to_ptr.hbm [resolvable:$true] %s130_s28 }
   0x6   :  { %v31_v9 = vadd.f32 %v30_v8, %v29_v7  ;;  %v109_v7 = vld [vmem:[%s259_s3] sm:$0x1]  ;;  %s128_s26 = sshll.u32 %s183_s25, 4  ;;  %s184_s3 = smov 128   ;;  %s129_s26 = int_to_ptr.vmem [resolvable:$true] %s128_s26 }
   0x7   :  { %s185_s29 = smov 8  }
   0x8   :  { %v32_v10 = vrot.slane %v31_v9, 4 }
   0xa   :  { %v33_v12 = vadd.f32 %v32_v10, %v31_v9 }
   0xc   :  { %v34_v13 = vrot.slane %v33_v12, 2  ;;  %58 = vperm.xlu0 %149, %v25_v11  }
   0xe   :  { %v35_v14 = vadd.f32 %v34_v13, %v33_v12 }
  0x10   :  { %v36_v15 = vrot.slane %v35_v14, 1 }
  0x12   :  { %v37_v16 = vadd.f32 %v36_v15, %v35_v14 }
  0x14   :  { %v38_v17 = vmax.f32 %v37_v16, 1.0 }
  0x16   :  { %151 = vrcp.f32 %v38_v17  ;;  %v50_v20 = vand.u32 2147483648, %v38_v17  ;;  %vm44_vm3 = vweird.f32 %v38_v17  ;;  %v48_v22 = vand.u32 2147483647, %v38_v17 }
  0x18   :  { %v51_v24 = vor.u32 1.1754944e-38, %v50_v20  ;;  %vm49_vm6 = vcmp.eq.f32.partialorder %v48_v22, 8.507059e+37 }
  0x1c   :  { %v152_v18 = vpop.eup %151 }
  0x1d   :  { %v40_v19 = vmul.f32 %v152_v18, %v38_v17  ;;  %vm45_vm4 = vweird.f32 %v152_v18 }
  0x1e   :  { %vm46_vm5 = vmor %vm44_vm3, %vm45_vm4 }
  0x1f   :  { %v41_v21 = vsub.f32 1.0, %v40_v19 }
  0x21   :  { %v42_v23 = vmul.f32 %v152_v18, %v41_v21 }
  0x23   :  { %v43_v25 = vadd.f32 %v152_v18, %v42_v23 }
  0x25   :  { %v47_v26 = vsel %vm46_vm5, %v152_v18, %v43_v25 }
  0x26   :  { %v52_v27 = vsel %vm49_vm6, %v51_v24, %v47_v26 }
  0x27   :  { %76 = vperm.xlu1 %150, %v52_v27  }
  0x76   :  { %v217_v28 = vpop.permute.xlu0 %55 }
  0x77   :  { %vm60_vm7 = vcmp.eq.s32.totalorder %v217_v28, 1 }
  0x78   :  { %v62_v30 = vsel %vm60_vm7, %v222_v29, 0.0 }
  0x79   :  { %v65_v33 = vsel %vm64_vm8, %v62_v30, 0.0 }
  0x7e   :  { %v59_v32 = vpop.permute.xlu0 %58 }
  0x7f   :  { %vm61_vm9 = vcmp.eq.s32.totalorder %v59_v32, 1 }
  0x80   :  { %v63_v34 = vsel %vm61_vm9, %v19_v31, 0.0 }
  0x81   :  { %v66_v35 = vsel %vm64_vm8, %v63_v34, 0.0 }
  0x82   :  { %v67_v36 = vadd.f32 %v66_v35, %v65_v33 }
  0x84   :  { %v68_v37 = vrot.slane %v67_v36, 4 }
  0x86   :  { %v69_v38 = vadd.f32 %v68_v37, %v67_v36 }
  0x88   :  { %v70_v39 = vrot.slane %v69_v38, 2 }
  0x8a   :  { %v71_v40 = vadd.f32 %v70_v39, %v69_v38 }
  0x8c   :  { %v72_v41 = vrot.slane %v71_v40, 1 }
  0x8e   :  { %v73_v42 = vadd.f32 %v72_v41, %v71_v40 }
  0x99   :  { %v77_v43 = vpop.permute.xlu1 %76 }
  0x9a   :  { %v79_v44 = vmul.f32 %v77_v43, %v73_v42 }
  0x9c   :  { %v80_v45 = vsub.f32 %v222_v29, %v79_v44  ;;  %v81_v46 = vsub.f32 %v19_v31, %v79_v44 }
  0x9e   :  { %v82_v47 = vsel %vm60_vm7, %v80_v45, 0.0  ;;  %v83_v48 = vsel %vm61_vm9, %v81_v46, 0.0 }
  0x9f   :  { %v84_v49 = vmul.f32 %v82_v47, %v82_v47  ;;  %v85_v50 = vmul.f32 %v83_v48, %v83_v48 }
  0xa1   :  { %v86_v51 = vsel %vm64_vm8, %v84_v49, 0.0  ;;  %v87_v52 = vsel %vm64_vm8, %v85_v50, 0.0 }
  0xa2   :  { %v88_v53 = vadd.f32 %v87_v52, %v86_v51 }
  0xa4   :  { %v89_v54 = vrot.slane %v88_v53, 4 }
  0xa6   :  { %v90_v55 = vadd.f32 %v89_v54, %v88_v53 }
  0xa8   :  { %v91_v56 = vrot.slane %v90_v55, 2 }
  0xaa   :  { %v92_v57 = vadd.f32 %v91_v56, %v90_v55 }
  0xac   :  { %v93_v58 = vrot.slane %v92_v57, 1 }
  0xae   :  { %v94_v59 = vadd.f32 %v93_v58, %v92_v57 }
  0xb0   :  { %v95_v60 = vmul.f32 %v94_v59, %v77_v43 }
  0xb2   :  { %v96_v61 = vadd.f32 1e-05, %v95_v60 }
  0xb4   :  { %153 = vrsqrt.f32 %v96_v61  ;;  %vm103_vm11 = vweird.f32 %v96_v61 }
  0xba   :  { %v154_v62 = vpop.eup %153 }
  0xbb   :  { %v98_v63 = vmul.f32 %v154_v62, %v96_v61  ;;  %vm104_vm10 = vweird.f32 %v154_v62 }
  0xbc   :  { %vm105_vm12 = vmor %vm103_vm11, %vm104_vm10 }
  0xbd   :  { %v99_v0 = vmul.f32 %v154_v62, %v98_v63 }
  0xbf   :  { %v100_v1 = vmul.f32 0.5, %v99_v0 }
  0xc1   :  { %v101_v2 = vsub.f32 1.5, %v100_v1 }
  0xc3   :  { %v102_v4 = vmul.f32 %v154_v62, %v101_v2 }
  0xc5   :  { %v106_v5 = vsel %vm105_vm12, %v154_v62, %v102_v4 }
  0xc6   :  { %v108_v6 = vmul.f32 %v107_v3, %v106_v5 }
  0xc8   :  { %v110_v8 = vmul.f32 %v108_v6, %v79_v44  ;;  %v112_v9 = vperm.slane %v108_v6, 0 }
  0xca   :  { %v111_v10 = vsub.f32 %v109_v7, %v110_v8  ;;  %v113_v11 = vmul.f32 %v112_v9, %v222_v29  ;;  %v114_v12 = vmul.f32 %v112_v9, %v19_v31 }
  0xcc   :  { %v116_v13 = vperm.slane %v111_v10, 0 }
  0xce   :  { %v118_v14 = vadd.f32 %v116_v13, %v113_v11  ;;  %v119_v15 = vadd.f32 %v116_v13, %v114_v12 }
  0xd0   :  { %v120_v16 = vsel %vm60_vm7, %v118_v14, %v222_v29  ;;  %v121_v17 = vsel %vm61_vm9, %v119_v15, %v19_v31 }
  0xd1   :  { %122 = vst.msk [vmem:[#allocation2] sm:$0xff] %vm64_vm8, %v120_v16 }
  0xd2   :  { %123 = vst.msk [vmem:[#allocation2 + $0x8] sm:$0xff] %vm64_vm8, %v121_v17 }
  0xd3   :  { %136 = dma.vmem_to_hbm [thread:$0]  %s129_s26, 256, %s131_s28, [#allocation3], %s184_s3, %s184_s3, %s185_s29  }
  0xd4   :  { %179 = dma.done.wait [#allocation3], 256  }
  0xd5   :  { %180 = vsyncadd [#allocation3], 4294967040 }
  0xd6   :  { %141 = vsyncpa [#allocation3], 1 }

</bundles_post_ra>
